<compile_context>
chip_gen: v7x
topology: tpu7x:2x2x1
jax: 0.10.0
libtpu: 0.0.40
codegen_flags: <defaults>
</compile_context>

<pallas_src>
import functools

import jax
import jax.numpy as jnp
from jax.experimental import pallas as pl
from jax.experimental.pallas import tpu as pltpu


_VMEM_LIMIT_BYTES = 32 * 1024 * 1024
_LN_EPS = 1e-5


def _layernorm_f32(x_f32, gamma, beta):
    mu = jnp.mean(x_f32, axis=-1, keepdims=True)
    var = jnp.mean((x_f32 - mu) ** 2, axis=-1, keepdims=True)
    return (x_f32 - mu) * jax.lax.rsqrt(var + _LN_EPS) * gamma + beta


# --------------------------------------------------------------------------------------
# Kernel A: LayerNorm1 + multi-head attention + output projection + residual.
# grid = (B, num_heads); head axis is a reduction (proj contributions accumulate).
# --------------------------------------------------------------------------------------
def _attn_block_kernel(x_ref, g1_ref, b1_ref, wqkv_ref, wproj_ref, bproj_ref,
                       *rest, n_real, num_heads, head_dim, scale,
                       with_attn, compute_dtype):
    if with_attn:
        out_ref, attn_ref, xn_scr, acc_scr = rest
    else:
        out_ref, xn_scr, acc_scr = rest
        attn_ref = None

    h_idx = pl.program_id(1)
    n_pad = x_ref.shape[1]

    # Compute LN1(x) once per batch item; zero the projection accumulator.
    @pl.when(h_idx == 0)
    def _init():
        xf = x_ref[0].astype(jnp.float32)
        xn = _layernorm_f32(xf, g1_ref[...], b1_ref[...])
        xn_scr[...] = xn.astype(xn_scr.dtype)
        acc_scr[...] = jnp.zeros_like(acc_scr)

    xn = xn_scr[...]                                                   # (N, C)

    # This head's q|k|v projection: full-C contraction on the MXU.
    qkv = jnp.dot(xn, wqkv_ref[0], preferred_element_type=jnp.float32)  # (N, 3*hd)
    qkv = qkv.astype(compute_dtype)
    q = qkv[:, 0:head_dim]
    k = qkv[:, head_dim:2 * head_dim]
    v = qkv[:, 2 * head_dim:3 * head_dim]

    # Scores without materializing k.T: contract the head_dim axes directly.
    scores = jax.lax.dot_general(
        q, k, dimension_numbers=(((1,), (1,)), ((), ())),
        preferred_element_type=jnp.float32) * scale                    # (N, N)

    if n_real != n_pad:  # mask padded key tokens
        key_ids = jax.lax.broadcasted_iota(jnp.int32, (1, n_pad), 1)
        scores = jnp.where(key_ids < n_real, scores, -1e30)

    # Numerically-stable softmax; denominator reciprocal on the EUP (+1 Newton step
    # to recover full f32 accuracy), multiply instead of dividing the (N, N) tensor.
    scores = scores - jnp.max(scores, axis=-1, keepdims=True)
    e = jnp.exp(scores)
    denom = jnp.sum(e, axis=-1, keepdims=True)
    inv = pl.reciprocal(denom, approx=True)
    inv = inv * (2.0 - denom * inv)
    p = e * inv                                                        # (N, N)

    if attn_ref is not None:
        attn_ref[0, 0] = p.astype(attn_ref.dtype)

    yh = jnp.dot(p.astype(compute_dtype), v,
                 preferred_element_type=jnp.float32)                   # (N, hd)
    # Accumulate this head's slice of the output projection (no concat needed).
    acc_scr[...] += jnp.dot(yh.astype(compute_dtype), wproj_ref[0],
                            preferred_element_type=jnp.float32)        # (N, C)

    @pl.when(h_idx == num_heads - 1)
    def _finalize():
        out_ref[0] = (x_ref[0].astype(jnp.float32) + acc_scr[...]
                      + bproj_ref[...].astype(jnp.float32)).astype(out_ref.dtype)


# --------------------------------------------------------------------------------------
# Kernel B: LayerNorm2 + MLP(GELU) + residual, hidden dimension H streamed in tiles.
# grid = (B, H // tH); hidden-tile axis is a reduction.
# --------------------------------------------------------------------------------------
def _mlp_block_kernel(x1_ref, g2_ref, b2_ref, w1_ref, bb1_ref, w2_ref, bb2_ref,
                      out_ref, h2_scr, acc_scr, *, compute_dtype):
    j = pl.program_id(1)

    @pl.when(j == 0)
    def _init():
        xf = x1_ref[0].astype(jnp.float32)
        h2 = _layernorm_f32(xf, g2_ref[...], b2_ref[...])
        h2_scr[...] = h2.astype(h2_scr.dtype)
        acc_scr[...] = jnp.zeros_like(acc_scr)

    m = jnp.dot(h2_scr[...], w1_ref[...],
                preferred_element_type=jnp.float32) + bb1_ref[...]     # (N, tH)
    m = jax.nn.gelu(m, approximate=False)                              # exact erf GELU
    acc_scr[...] += jnp.dot(m.astype(compute_dtype), w2_ref[...],
                            preferred_element_type=jnp.float32)        # (N, C)

    @pl.when(j == pl.num_programs(1) - 1)
    def _finalize():
        out_ref[0] = (x1_ref[0].astype(jnp.float32) + acc_scr[...]
                      + bb2_ref[...].astype(jnp.float32)).astype(out_ref.dtype)


def _pick_mlp_tile(hidden):
    for cand in (512, 384, 256, 128):
        if hidden % cand == 0:
            return cand
    return hidden


def vit_block_pallas(x, params, *, num_heads, return_attn=True,
                     compute_dtype=None, pad_to_multiple=8, mlp_tile_h=None):
    B, N, C = x.shape
    assert C % num_heads == 0
    head_dim = C // num_heads
    scale = head_dim ** (-0.5)
    H = params["w1"].shape[1]

    cdtype = jnp.dtype(compute_dtype) if compute_dtype is not None else jnp.dtype(x.dtype)
    out_dtype = x.dtype

    # Pad tokens so the last two dims of every block stay layout-friendly.
    n_pad = ((N + pad_to_multiple - 1) // pad_to_multiple) * pad_to_multiple
    x_p = x if n_pad == N else jnp.pad(x, ((0, 0), (0, n_pad - N), (0, 0)))

    f32 = jnp.float32
    g1 = params["g1"].reshape(1, C).astype(f32)
    b1 = params["b1"].reshape(1, C).astype(f32)
    g2 = params["g2"].reshape(1, C).astype(f32)
    b2 = params["b2"].reshape(1, C).astype(f32)
    bproj = params["bproj"].reshape(1, C).astype(f32)
    bb1 = params["bb1"].reshape(1, H).astype(f32)
    bb2 = params["bb2"].reshape(1, C).astype(f32)

    # Per-head weight layouts so head selection happens in BlockSpec index maps
    # (no in-kernel lane slicing / transposes / concatenation).
    wqkv_h = (params["wqkv"].astype(cdtype)
              .reshape(C, 3, num_heads, head_dim)
              .transpose(2, 0, 1, 3)
              .reshape(num_heads, C, 3 * head_dim))                    # (nh, C, 3*hd)
    wproj_h = params["wproj"].astype(cdtype).reshape(num_heads, head_dim, C)
    w1 = params["w1"].astype(cdtype)                                   # (C, H)
    w2 = params["w2"].astype(cdtype)                                   # (H, C)

    if mlp_tile_h is None:
        mlp_tile_h = _pick_mlp_tile(H)
    assert H % mlp_tile_h == 0
    n_h_tiles = H // mlp_tile_h

    cbytes = jnp.dtype(cdtype).itemsize
    xbytes = jnp.dtype(x.dtype).itemsize

    # ------------------------- Kernel A call -------------------------
    a_kernel = functools.partial(
        _attn_block_kernel, n_real=N, num_heads=num_heads, head_dim=head_dim,
        scale=scale, with_attn=return_attn, compute_dtype=cdtype)

    a_out_shape = [jax.ShapeDtypeStruct((B, n_pad, C), out_dtype)]
    a_out_specs = [pl.BlockSpec((1, n_pad, C), lambda b, h: (b, 0, 0))]
    if return_attn:
        a_out_shape.append(jax.ShapeDtypeStruct((B, num_heads, n_pad, n_pad), cdtype))
        a_out_specs.append(pl.BlockSpec((1, 1, n_pad, n_pad), lambda b, h: (b, h, 0, 0)))

    a_cost = pl.CostEstimate(
        flops=B * (8 * n_pad * C * C + 4 * n_pad * n_pad * C),
        transcendentals=B * num_heads * n_pad * n_pad,
        bytes_accessed=(2 * B * n_pad * C * xbytes + 4 * C * C * cbytes
                        + (B * num_heads * n_pad * n_pad * cbytes if return_attn else 0)),
    )

    a_grid = pltpu.PrefetchScalarGridSpec(
        num_scalar_prefetch=0,
        grid=(B, num_heads),
        in_specs=[
            pl.BlockSpec((1, n_pad, C), lambda b, h: (b, 0, 0)),           # x
            pl.BlockSpec((1, C), lambda b, h: (0, 0)),                     # ln1 gamma
            pl.BlockSpec((1, C), lambda b, h: (0, 0)),                     # ln1 beta
            pl.BlockSpec((1, C, 3 * head_dim), lambda b, h: (h, 0, 0)),    # per-head qkv W
            pl.BlockSpec((1, head_dim, C), lambda b, h: (h, 0, 0)),        # per-head proj W
            pl.BlockSpec((1, C), lambda b, h: (0, 0)),                     # proj bias
        ],
        out_specs=tuple(a_out_specs),
        scratch_shapes=[pltpu.VMEM((n_pad, C), cdtype),        # cached LN1(x)
                        pltpu.VMEM((n_pad, C), jnp.float32)],  # proj accumulator
    )

    a_results = pl.pallas_call(
        a_kernel,
        out_shape=tuple(a_out_shape),
        grid_spec=a_grid,
        compiler_params=pltpu.CompilerParams(
            dimension_semantics=("parallel", "arbitrary"),
            vmem_limit_bytes=_VMEM_LIMIT_BYTES),
        cost_estimate=a_cost,
    )(x_p, g1, b1, wqkv_h, wproj_h, bproj)

    if return_attn:
        x1_p, attn_p = a_results
    else:
        (x1_p,) = a_results

    # ------------------------- Kernel B call -------------------------
    b_cost = pl.CostEstimate(
        flops=4 * B * n_pad * C * H,
        transcendentals=B * n_pad * H,
        bytes_accessed=2 * B * n_pad * C * xbytes + 2 * C * H * cbytes,
    )

    b_grid = pltpu.PrefetchScalarGridSpec(
        num_scalar_prefetch=0,
        grid=(B, n_h_tiles),
        in_specs=[
            pl.BlockSpec((1, n_pad, C), lambda b, j: (b, 0, 0)),   # x1 (attn output)
            pl.BlockSpec((1, C), lambda b, j: (0, 0)),             # ln2 gamma
            pl.BlockSpec((1, C), lambda b, j: (0, 0)),             # ln2 beta
            pl.BlockSpec((C, mlp_tile_h), lambda b, j: (0, j)),    # fc1 W tile (streamed)
            pl.BlockSpec((1, mlp_tile_h), lambda b, j: (0, j)),    # fc1 bias tile
            pl.BlockSpec((mlp_tile_h, C), lambda b, j: (j, 0)),    # fc2 W tile (streamed)
            pl.BlockSpec((1, C), lambda b, j: (0, 0)),             # fc2 bias
        ],
        out_specs=(pl.BlockSpec((1, n_pad, C), lambda b, j: (b, 0, 0)),),
        scratch_shapes=[pltpu.VMEM((n_pad, C), cdtype),        # cached LN2(x1)
                        pltpu.VMEM((n_pad, C), jnp.float32)],  # MLP accumulator
    )

    (out_p,) = pl.pallas_call(
        functools.partial(_mlp_block_kernel, compute_dtype=cdtype),
        out_shape=(jax.ShapeDtypeStruct((B, n_pad, C), out_dtype),),
        grid_spec=b_grid,
        compiler_params=pltpu.CompilerParams(
            dimension_semantics=("parallel", "arbitrary"),
            vmem_limit_bytes=_VMEM_LIMIT_BYTES),
        cost_estimate=b_cost,
    )(x1_p, g2, b2, w1, bb1, w2, bb2)

    out = out_p[:, :N, :]
    if return_attn:
        return out, attn_p[:, :, :N, :N]
    return out


# --------------------------------------------------------------------------------------
# Pure-JAX reference mirroring the PyTorch forward (f32).
# --------------------------------------------------------------------------------------
def vit_block_reference(x, params, *, num_heads):
    B, N, C = x.shape
    hd = C // num_heads
    scale = hd ** (-0.5)

    def ln(v, g, b):
        mu = jnp.mean(v, axis=-1, keepdims=True)
        var = jnp.mean((v - mu) ** 2, axis=-1, keepdims=True)
        return (v - mu) * jax.lax.rsqrt(var + _LN_EPS) * g + b

    h = ln(x, params["g1"], params["b1"])
    qkv = h @ params["wqkv"]                                    # (B, N, 3C)
    qkv = qkv.reshape(B, N, 3, num_heads, hd).transpose(2, 0, 3, 1, 4)
    q, k, v = qkv[0], qkv[1], qkv[2]                            # (B, nh, N, hd)
    attn = jnp.einsum("bhqd,bhkd->bhqk", q, k) * scale
    attn = jax.nn.softmax(attn, axis=-1)
    y = jnp.einsum("bhqk,bhkd->bhqd", attn, v)
    y = y.transpose(0, 2, 1, 3).reshape(B, N, C)
    y = y @ params["wproj"] + params["bproj"]
    x1 = x + y
    h2 = ln(x1, params["g2"], params["b2"])
    m = jax.nn.gelu(h2 @ params["w1"] + params["bb1"], approximate=False)
    m = m @ params["w2"] + params["bb2"]
    return x1 + m, attn


def _make_params(key, C, H):
    ks = jax.random.split(key, 7)
    return {
        "g1": jnp.ones((1, C), jnp.float32),
        "b1": jnp.zeros((1, C), jnp.float32),
        "wqkv": jax.random.normal(ks[0], (C, 3 * C), jnp.float32) * 0.05,
        "wproj": jax.random.normal(ks[1], (C, C), jnp.float32) * 0.05,
        "bproj": jax.random.normal(ks[2], (1, C), jnp.float32) * 0.01,
        "g2": jnp.ones((1, C), jnp.float32),
        "b2": jnp.zeros((1, C), jnp.float32),
        "w1": jax.random.normal(ks[3], (C, H), jnp.float32) * 0.05,
        "bb1": jax.random.normal(ks[4], (1, H), jnp.float32) * 0.01,
        "w2": jax.random.normal(ks[5], (H, C), jnp.float32) * 0.05,
        "bb2": jax.random.normal(ks[6], (1, C), jnp.float32) * 0.01,
    }


if __name__ == "__main__":
    # Small shapes consistent with the module: dim=32, num_heads=4, mlp_ratio=4
    num_heads = 4
    C = 32
    H = int(C * 4.0)

    key = jax.random.PRNGKey(0)
    kp, kx1, kx2 = jax.random.split(key, 3)
    params = _make_params(kp, C, H)

    # --- Test 1: f32, N multiple of 8 (no padding path) ---------------------------
    x = jax.random.normal(kx1, (2, 8, C), jnp.float32)
    out, attn = vit_block_pallas(x, params, num_heads=num_heads)
    jax.block_until_ready((out, attn))
    ref_out, ref_attn = vit_block_reference(x, params, num_heads=num_heads)
    assert out.shape == ref_out.shape and attn.shape == ref_attn.shape
    assert jnp.allclose(out, ref_out, atol=5e-4, rtol=5e-4), "f32 output mismatch"
    assert jnp.allclose(attn, ref_attn, atol=1e-4, rtol=1e-3), "f32 attn mismatch"

    # Attention-probability output is optional (saves its HBM writes when unused).
    out_only = vit_block_pallas(x, params, num_heads=num_heads, return_attn=False)
    jax.block_until_ready(out_only)
    assert jnp.allclose(out_only, ref_out, atol=5e-4, rtol=5e-4), "no-attn output mismatch"

    # --- Test 2: f32, ragged N=11 (padded to 16, padded keys masked) ---------------
    x2 = jax.random.normal(kx2, (2, 11, C), jnp.float32)
    out2, attn2 = vit_block_pallas(x2, params, num_heads=num_heads)
    jax.block_until_ready((out2, attn2))
    ref_out2, ref_attn2 = vit_block_reference(x2, params, num_heads=num_heads)
    assert jnp.allclose(out2, ref_out2, atol=5e-4, rtol=5e-4), "padded output mismatch"
    assert jnp.allclose(attn2, ref_attn2, atol=1e-4, rtol=1e-3), "padded attn mismatch"

    # --- Test 3: bf16 matmuls with f32 accumulation / f32 LN-softmax-GELU ----------
    out3, attn3 = vit_block_pallas(x, params, num_heads=num_heads,
                                   compute_dtype=jnp.bfloat16)
    jax.block_until_ready((out3, attn3))
    assert out3.dtype == x.dtype and attn3.dtype == jnp.bfloat16
    assert jnp.allclose(out3.astype(jnp.float32), ref_out, atol=3e-2, rtol=3e-2), \
        "bf16 output mismatch"
    assert jnp.allclose(attn3.astype(jnp.float32), ref_attn, atol=3e-2, rtol=3e-2), \
        "bf16 attn mismatch"

    print("KERNEL_OK")
</pallas_src>

<mosaic_0001>
module attributes {stable_mosaic.version = 11 : i64} {
  func.func @_attn_block_kernel(%arg0: i32, %arg1: i32, %arg2: memref<1x8x32xf32, #tpu.memory_space<vmem>>, %arg3: memref<1x32xf32, #tpu.memory_space<vmem>>, %arg4: memref<1x32xf32, #tpu.memory_space<vmem>>, %arg5: memref<1x32x24xf32, #tpu.memory_space<vmem>>, %arg6: memref<1x8x32xf32, #tpu.memory_space<vmem>>, %arg7: memref<1x32xf32, #tpu.memory_space<vmem>>, %arg8: memref<1x8x32xf32, #tpu.memory_space<vmem>>, %arg9: memref<1x1x8x8xf32, #tpu.memory_space<vmem>>, %arg10: memref<8x32xf32, #tpu.memory_space<vmem>>, %arg11: memref<8x32xf32, #tpu.memory_space<vmem>>) attributes {dimension_semantics = [#tpu.dimension_semantics<parallel>, #tpu.dimension_semantics<arbitrary>], iteration_bounds = array<i64: 2, 4>, scalar_prefetch = 0 : i64, scratch_operands = 2 : i64, tpu.core_type = #tpu.core_type<tc>, window_params = [{transform_indices = @transform_0, window_bounds = array<i64: 1, 8, 32>}, {pipeline_mode = #tpu.pipeline_mode<synchronous>, transform_indices = @transform_1, window_bounds = array<i64: 1, 32>}, {pipeline_mode = #tpu.pipeline_mode<synchronous>, transform_indices = @transform_2, window_bounds = array<i64: 1, 32>}, {transform_indices = @transform_3, window_bounds = array<i64: 1, 32, 24>}, {transform_indices = @transform_4, window_bounds = array<i64: 1, 8, 32>}, {pipeline_mode = #tpu.pipeline_mode<synchronous>, transform_indices = @transform_5, window_bounds = array<i64: 1, 32>}, {transform_indices = @transform_6, window_bounds = array<i64: 1, 8, 32>}, {transform_indices = @transform_7, window_bounds = array<i64: 1, 1, 8, 8>}]} {
    %c0_i32 = arith.constant 0 : i32
    %0 = arith.cmpi eq, %arg1, %c0_i32 : i32
    %1 = arith.extui %0 : i1 to i32
    %c0_i32_0 = arith.constant 0 : i32
    %2 = arith.cmpi ne, %1, %c0_i32_0 : i32
    scf.if %2 {
      %c0_24 = arith.constant 0 : index
      %c0_25 = arith.constant 0 : index
      %c0_26 = arith.constant 0 : index
      %40 = vector.load %arg2[%c0_24, %c0_25, %c0_26] : memref<1x8x32xf32, #tpu.memory_space<vmem>>, vector<1x8x32xf32>
      %41 = vector.shape_cast %40 : vector<1x8x32xf32> to vector<8x32xf32>
      %c0_27 = arith.constant 0 : index
      %c0_28 = arith.constant 0 : index
      %42 = vector.load %arg3[%c0_27, %c0_28] : memref<1x32xf32, #tpu.memory_space<vmem>>, vector<1x32xf32>
      %c0_29 = arith.constant 0 : index
      %c0_30 = arith.constant 0 : index
      %43 = vector.load %arg4[%c0_29, %c0_30] : memref<1x32xf32, #tpu.memory_space<vmem>>, vector<1x32xf32>
      %cst_31 = arith.constant dense<0.000000e+00> : vector<8xf32>
      %44 = vector.multi_reduction <add>, %41, %cst_31 [1] : vector<8x32xf32> to vector<8xf32>
      %45 = vector.shape_cast %44 : vector<8xf32> to vector<8x1xf32>
      %cst_32 = arith.constant 3.200000e+01 : f32
      %46 = vector.broadcast %cst_32 : f32 to vector<8x1xf32>
      %47 = arith.divf %45, %46 : vector<8x1xf32>
      %48 = vector.broadcast %47 : vector<8x1xf32> to vector<8x32xf32>
      %49 = arith.subf %41, %48 : vector<8x32xf32>
      %50 = arith.mulf %49, %49 : vector<8x32xf32>
      %cst_33 = arith.constant dense<0.000000e+00> : vector<8xf32>
      %51 = vector.multi_reduction <add>, %50, %cst_33 [1] : vector<8x32xf32> to vector<8xf32>
      %52 = vector.shape_cast %51 : vector<8xf32> to vector<8x1xf32>
      %cst_34 = arith.constant 3.200000e+01 : f32
      %53 = vector.broadcast %cst_34 : f32 to vector<8x1xf32>
      %54 = arith.divf %52, %53 : vector<8x1xf32>
      %55 = vector.broadcast %47 : vector<8x1xf32> to vector<8x32xf32>
      %56 = arith.subf %41, %55 : vector<8x32xf32>
      %cst_35 = arith.constant 9.99999974E-6 : f32
      %57 = vector.broadcast %cst_35 : f32 to vector<8x1xf32>
      %58 = arith.addf %54, %57 : vector<8x1xf32>
      %59 = math.rsqrt %58 : vector<8x1xf32>
      %60 = vector.broadcast %59 : vector<8x1xf32> to vector<8x32xf32>
      %61 = arith.mulf %56, %60 : vector<8x32xf32>
      %62 = vector.broadcast %42 : vector<1x32xf32> to vector<8x32xf32>
      %63 = arith.mulf %61, %62 : vector<8x32xf32>
      %64 = vector.broadcast %43 : vector<1x32xf32> to vector<8x32xf32>
      %65 = arith.addf %63, %64 : vector<8x32xf32>
      %c0_36 = arith.constant 0 : index
      %c0_37 = arith.constant 0 : index
      %66 = vector.load %arg10[%c0_36, %c0_37] : memref<8x32xf32, #tpu.memory_space<vmem>>, vector<8x32xf32>
      tpu.vector_store %arg10[%c0_36, %c0_37], %65 {strides = array<i32>} : memref<8x32xf32, #tpu.memory_space<vmem>>, vector<8x32xf32>,
      %cst_38 = arith.constant 0.000000e+00 : f32
      %67 = vector.broadcast %cst_38 : f32 to vector<8x32xf32>
      %c0_39 = arith.constant 0 : index
      %c0_40 = arith.constant 0 : index
      %68 = vector.load %arg11[%c0_39, %c0_40] : memref<8x32xf32, #tpu.memory_space<vmem>>, vector<8x32xf32>
      tpu.vector_store %arg11[%c0_39, %c0_40], %67 {strides = array<i32>} : memref<8x32xf32, #tpu.memory_space<vmem>>, vector<8x32xf32>,
    } else {
    }
    %c0 = arith.constant 0 : index
    %c0_1 = arith.constant 0 : index
    %3 = vector.load %arg10[%c0, %c0_1] : memref<8x32xf32, #tpu.memory_space<vmem>>, vector<8x32xf32>
    %c0_2 = arith.constant 0 : index
    %c0_3 = arith.constant 0 : index
    %c0_4 = arith.constant 0 : index
    %4 = vector.load %arg5[%c0_2, %c0_3, %c0_4] : memref<1x32x24xf32, #tpu.memory_space<vmem>>, vector<1x32x24xf32>
    %5 = vector.shape_cast %4 : vector<1x32x24xf32> to vector<32x24xf32>
    %cst = arith.constant dense<0.000000e+00> : vector<8x24xf32>
    %6 = tpu.matmul %3, %5, %cst {dimension_numbers = #tpu.dot_dimension_numbers<[1], [0], [0], [1], [0, 0, 1, 1], [], []>} : vector<8x32xf32>, vector<32x24xf32>, vector<8x24xf32> -> vector<8x24xf32>
    %7 = vector.extract_strided_slice %6 {offsets = [0, 0], sizes = [8, 8], strides = [1, 1]} : vector<8x24xf32> to vector<8x8xf32>
    %8 = vector.extract_strided_slice %6 {offsets = [0, 8], sizes = [8, 8], strides = [1, 1]} : vector<8x24xf32> to vector<8x8xf32>
    %9 = vector.extract_strided_slice %6 {offsets = [0, 16], sizes = [8, 8], strides = [1, 1]} : vector<8x24xf32> to vector<8x8xf32>
    %cst_5 = arith.constant dense<0.000000e+00> : vector<8x8xf32>
    %10 = tpu.matmul %7, %8, %cst_5 {dimension_numbers = #tpu.dot_dimension_numbers<[1], [1], [0], [0], [0, 0, 1, 0], [], []>} : vector<8x8xf32>, vector<8x8xf32>, vector<8x8xf32> -> vector<8x8xf32>
    %cst_6 = arith.constant 0.353553385 : f32
    %11 = vector.broadcast %cst_6 : f32 to vector<8x8xf32>
    %12 = arith.mulf %10, %11 : vector<8x8xf32>
    %cst_7 = arith.constant dense<0xFF800000> : vector<8xf32>
    %13 = vector.multi_reduction <maximumf>, %12, %cst_7 [1] : vector<8x8xf32> to vector<8xf32>
    %14 = vector.shape_cast %13 : vector<8xf32> to vector<8x1xf32>
    %15 = vector.broadcast %14 : vector<8x1xf32> to vector<8x8xf32>
    %16 = arith.subf %12, %15 : vector<8x8xf32>
    %17 = math.exp %16 : vector<8x8xf32>
    %cst_8 = arith.constant dense<0.000000e+00> : vector<8xf32>
    %18 = vector.multi_reduction <add>, %17, %cst_8 [1] : vector<8x8xf32> to vector<8xf32>
    %19 = vector.shape_cast %18 : vector<8xf32> to vector<8x1xf32>
    %20 = tpu.reciprocal %19 {approx = true} : vector<8x1xf32> -> vector<8x1xf32>
    %21 = arith.mulf %19, %20 : vector<8x1xf32>
    %cst_9 = arith.constant 2.000000e+00 : f32
    %22 = vector.broadcast %cst_9 : f32 to vector<8x1xf32>
    %23 = arith.subf %22, %21 : vector<8x1xf32>
    %24 = arith.mulf %20, %23 : vector<8x1xf32>
    %25 = vector.broadcast %24 : vector<8x1xf32> to vector<8x8xf32>
    %26 = arith.mulf %17, %25 : vector<8x8xf32>
    %c0_10 = arith.constant 0 : index
    %c0_11 = arith.constant 0 : index
    %c0_12 = arith.constant 0 : index
    %c0_13 = arith.constant 0 : index
    %27 = vector.load %arg9[%c0_10, %c0_11, %c0_12, %c0_13] : memref<1x1x8x8xf32, #tpu.memory_space<vmem>>, vector<1x1x8x8xf32>
    %28 = vector.shape_cast %27 : vector<1x1x8x8xf32> to vector<8x8xf32>
    %29 = vector.shape_cast %26 : vector<8x8xf32> to vector<1x1x8x8xf32>
    tpu.vector_store %arg9[%c0_10, %c0_11, %c0_12, %c0_13], %29 {strides = array<i32>} : memref<1x1x8x8xf32, #tpu.memory_space<vmem>>, vector<1x1x8x8xf32>,
    %cst_14 = arith.constant dense<0.000000e+00> : vector<8x8xf32>
    %30 = tpu.matmul %26, %9, %cst_14 {dimension_numbers = #tpu.dot_dimension_numbers<[1], [0], [0], [1], [0, 0, 1, 1], [], []>} : vector<8x8xf32>, vector<8x8xf32>, vector<8x8xf32> -> vector<8x8xf32>
    %c0_15 = arith.constant 0 : index
    %c0_16 = arith.constant 0 : index
    %31 = vector.load %arg11[%c0_15, %c0_16] : memref<8x32xf32, #tpu.memory_space<vmem>>, vector<8x32xf32>
    %c0_17 = arith.constant 0 : index
    %c0_18 = arith.constant 0 : index
    %c0_19 = arith.constant 0 : index
    %32 = vector.load %arg6[%c0_17, %c0_18, %c0_19] : memref<1x8x32xf32, #tpu.memory_space<vmem>>, vector<1x8x32xf32>
    %33 = vector.shape_cast %32 : vector<1x8x32xf32> to vector<8x32xf32>
    %cst_20 = arith.constant dense<0.000000e+00> : vector<8x32xf32>
    %34 = tpu.matmul %30, %33, %cst_20 {dimension_numbers = #tpu.dot_dimension_numbers<[1], [0], [0], [1], [0, 0, 1, 1], [], []>} : vector<8x8xf32>, vector<8x32xf32>, vector<8x32xf32> -> vector<8x32xf32>
    %35 = arith.addf %31, %34 : vector<8x32xf32>
    %c0_21 = arith.constant 0 : index
    %c0_22 = arith.constant 0 : index
    %36 = vector.load %arg11[%c0_21, %c0_22] : memref<8x32xf32, #tpu.memory_space<vmem>>, vector<8x32xf32>
    tpu.vector_store %arg11[%c0_21, %c0_22], %35 {strides = array<i32>} : memref<8x32xf32, #tpu.memory_space<vmem>>, vector<8x32xf32>,
    %c3_i32 = arith.constant 3 : i32
    %37 = arith.cmpi eq, %arg1, %c3_i32 : i32
    %38 = arith.extui %37 : i1 to i32
    %c0_i32_23 = arith.constant 0 : i32
    %39 = arith.cmpi ne, %38, %c0_i32_23 : i32
    scf.if %39 {
      %c0_24 = arith.constant 0 : index
      %c0_25 = arith.constant 0 : index
      %c0_26 = arith.constant 0 : index
      %40 = vector.load %arg2[%c0_24, %c0_25, %c0_26] : memref<1x8x32xf32, #tpu.memory_space<vmem>>, vector<1x8x32xf32>
      %41 = vector.shape_cast %40 : vector<1x8x32xf32> to vector<8x32xf32>
      %c0_27 = arith.constant 0 : index
      %c0_28 = arith.constant 0 : index
      %42 = vector.load %arg11[%c0_27, %c0_28] : memref<8x32xf32, #tpu.memory_space<vmem>>, vector<8x32xf32>
      %43 = arith.addf %41, %42 : vector<8x32xf32>
      %c0_29 = arith.constant 0 : index
      %c0_30 = arith.constant 0 : index
      %44 = vector.load %arg7[%c0_29, %c0_30] : memref<1x32xf32, #tpu.memory_space<vmem>>, vector<1x32xf32>
      %45 = vector.broadcast %44 : vector<1x32xf32> to vector<8x32xf32>
      %46 = arith.addf %43, %45 : vector<8x32xf32>
      %c0_31 = arith.constant 0 : index
      %c0_32 = arith.constant 0 : index
      %c0_33 = arith.constant 0 : index
      %47 = vector.load %arg8[%c0_31, %c0_32, %c0_33] : memref<1x8x32xf32, #tpu.memory_space<vmem>>, vector<1x8x32xf32>
      %48 = vector.shape_cast %47 : vector<1x8x32xf32> to vector<8x32xf32>
      %49 = vector.shape_cast %46 : vector<8x32xf32> to vector<1x8x32xf32>
      tpu.vector_store %arg8[%c0_31, %c0_32, %c0_33], %49 {strides = array<i32>} : memref<1x8x32xf32, #tpu.memory_space<vmem>>, vector<1x8x32xf32>,
    } else {
    }
    return
  }
  func.func @transform_0(%arg0: i32, %arg1: i32) -> (i32, i32, i32) {
    %c0_i32 = arith.constant 0 : i32
    %c0_i32_0 = arith.constant 0 : i32
    %c0_i32_1 = arith.constant 0 : i32
    return %arg0, %c0_i32, %c0_i32_0 : i32, i32, i32
  }
  func.func @transform_1(%arg0: i32, %arg1: i32) -> (i32, i32) {
    %c0_i32 = arith.constant 0 : i32
    %c0_i32_0 = arith.constant 0 : i32
    %c0_i32_1 = arith.constant 0 : i32
    return %c0_i32, %c0_i32_0 : i32, i32
  }
  func.func @transform_2(%arg0: i32, %arg1: i32) -> (i32, i32) {
    %c0_i32 = arith.constant 0 : i32
    %c0_i32_0 = arith.constant 0 : i32
    %c0_i32_1 = arith.constant 0 : i32
    return %c0_i32, %c0_i32_0 : i32, i32
  }
  func.func @transform_3(%arg0: i32, %arg1: i32) -> (i32, i32, i32) {
    %c0_i32 = arith.constant 0 : i32
    %c0_i32_0 = arith.constant 0 : i32
    %c0_i32_1 = arith.constant 0 : i32
    return %arg1, %c0_i32, %c0_i32_0 : i32, i32, i32
  }
  func.func @transform_4(%arg0: i32, %arg1: i32) -> (i32, i32, i32) {
    %c0_i32 = arith.constant 0 : i32
    %c0_i32_0 = arith.constant 0 : i32
    %c0_i32_1 = arith.constant 0 : i32
    return %arg1, %c0_i32, %c0_i32_0 : i32, i32, i32
  }
  func.func @transform_5(%arg0: i32, %arg1: i32) -> (i32, i32) {
    %c0_i32 = arith.constant 0 : i32
    %c0_i32_0 = arith.constant 0 : i32
    %c0_i32_1 = arith.constant 0 : i32
    return %c0_i32, %c0_i32_0 : i32, i32
  }
  func.func @transform_6(%arg0: i32, %arg1: i32) -> (i32, i32, i32) {
    %c0_i32 = arith.constant 0 : i32
    %c0_i32_0 = arith.constant 0 : i32
    %c0_i32_1 = arith.constant 0 : i32
    return %arg0, %c0_i32, %c0_i32_0 : i32, i32, i32
  }
  func.func @transform_7(%arg0: i32, %arg1: i32) -> (i32, i32, i32, i32) {
    %c0_i32 = arith.constant 0 : i32
    %c0_i32_0 = arith.constant 0 : i32
    %c0_i32_1 = arith.constant 0 : i32
    return %arg0, %arg1, %c0_i32, %c0_i32_0 : i32, i32, i32, i32
  }
}

</mosaic_0001>

<bundles_post_ra>
// kernel: tpu_custom_call.1
= control target key start
LH: loop header
LB: loop body
LE: loop exit
PB: predicated region body
PF: predicated region fallthrough
CT: control target
= control target key end

     0   :  { %s1545_s0 = inlined_call_operand.vmem [shape: f32[2,8,32], index: 0, kind: input, shape index: {}]   ;;  %s1546_s1 = inlined_call_operand.vmem [shape: f32[1,32], index: 1, kind: input, shape index: {}]   ;;  %s1547_s2 = inlined_call_operand.vmem [shape: f32[1,32], index: 2, kind: input, shape index: {}]   ;;  %s1548_s3 = inlined_call_operand.vmem [shape: f32[4,32,24], index: 3, kind: input, shape index: {}]   ;;  %s1549_s4 = inlined_call_operand.vmem [shape: f32[4,8,32], index: 4, kind: input, shape index: {}]   ;;  %s1550_s5 = inlined_call_operand.vmem [shape: f32[1,32], index: 5, kind: input, shape index: {}]   ;;  %s1551_s6 = inlined_call_operand.hbm [shape: f32[2,8,32], index: 6, kind: output, shape index: {0}]   ;;  %s1552_s7 = inlined_call_operand.hbm [shape: f32[2,4,8,8], index: 7, kind: output, shape index: {1}]  }
   0x1   :  { %1568 = sst [smem:[#allocation23_spill]] %s1552_s7 }
   0x2   :  { %13 = vsyncpa [#allocation5], 0 }
   0x3   :  { %15 = vsyncpa [#allocation5 + $0x1], 0 }
   0x4   :  { %16 = vsyncpa [#allocation7], 0 }
   0x5   :  { %18 = vsyncpa [#allocation7 + $0x1], 0  ;;  %s1262_s24 = smov 0   ;;  %s1264_s25 = smov 0  }
   0x6   :  { %s1266_s26 = smov 0   ;;  %s1268_s27 = smov 0  }
   0x7   :  { %s1270_s28 = smov 0   ;;  %s1272_s29 = smov 0  }
   0x8   :  { %s1274_s30 = smov 0   ;;  %s1276_s8 = smov 0  }
   0x9   :  { %s1278_s9 = smov 0   ;;  %s1280_s10 = smov 0  }
   0xa   :  { %s1282_s11 = smov 0  }
   0xb LB: > { %1569 = sst [smem:[#allocation10_spill]] %s1172_s24  ;;  %s878_s12 = sadd.s32 4294967295, %s1212_s11   ;;  %s1212_s11 = sphi %s1282_s11, %s24_s11   ;;  %s1208_s10 = sphi %s1280_s10, %s1604_s10   ;;  %s1204_s9 = sphi %s1278_s9, %s1603_s9   ;;  %s1200_s8 = sphi %s1276_s8, %s1602_s8   ;;  %s1196_s30 = sphi %s1274_s30, %s1601_s30   ;;  %s1192_s29 = sphi %s1272_s29, %s1600_s29   ;;  %s1188_s28 = sphi %s1270_s28, %s1608_s28   ;;  %s1184_s27 = sphi %s1268_s27, %s1607_s27   ;;  %s1180_s26 = sphi %s1266_s26, %s1598_s26   ;;  %s1176_s25 = sphi %s1264_s25, %s1606_s25   ;;  %s1172_s24 = sphi %s1262_s24, %s1605_s24  }
   0xc   : > { %1570 = sst [smem:[#allocation11_spill]] %s1180_s26  ;;  %s879_s13 = sadd.s32 4294967294, %s1212_s11  }
   0xd   : > { %1571 = sst [smem:[#allocation12_spill]] %s1184_s27  ;;  %s33_s14 = sadd.s32 1, %s1204_s9 }
   0xe   : > { %1572 = sst [smem:[#allocation13_spill]] %s1192_s29  ;;  %s36_s15 = sadd.s32 1, %s1208_s10 }
   0xf   : > { %1573 = sst [smem:[#allocation14_spill]] %s1204_s9  ;;  %p34_p0 = scmp.ge.s32.totalorder %s33_s14, 4 }
  0x10   : > { %1574 = sst [smem:[#allocation15_spill]] %s1208_s10  ;;  %s184_s16 = sadd.s32 1, %s1192_s29 }
  0x11   : > { %1575 = sst [smem:[#allocation16_spill]] %s1212_s11  ;;  %p194_p1 = scmp.ne.s32.totalorder %s1192_s29, %s1188_s28 }
  0x12   : > { %p1324_p2 = scmp.eq.s32.totalorder %s878_s12, 7  ;;  %s1610_s14 = smov (%p34_p0, %s33_s14), 0 }
  0x13   : > { %1577 = sst [smem:[#allocation17_spill]] %s1610_s14  ;;  %s1612_s15 = smov (!%p34_p0, %s36_s15), %s1208_s10 }
  0x14   : > { %p1333_p3 = por %p1324_p2, %p194_p1  ;;  %p200_p4 = scmp.ne.s32.totalorder %s1188_s28, %s1184_s27 }
  0x15   : > { %p38_p5 = scmp.ge.s32.totalorder %s1612_s15, 2  ;;  %p1339_p6 = scmp.eq.s32.totalorder %s879_s13, 7 }
  0x16   : > { %s208_s20 = ssub.s32 %s1204_s9, %s1610_s14  ;;  %s212_s21 = sadd.s32 1, %s1180_s26 }
  0x17   : > { %s1614_s15 = smov (%p38_p5, %s1612_s15), 0  ;;  %p1350_p7 = por %p1339_p6, %p200_p4 }
  0x18   : > { %1580 = sst [smem:[#allocation18_spill]] %s1614_s15  ;;  %p222_p8 = scmp.ne.s32.totalorder %s1180_s26, %s1176_s25 }
  0x19   : > { %s1581_s22 = scalar_select %p1350_p7, 1, 0 }
  0x1a   : > { %s181_s23 = ssub.s32 %s1208_s10, %s1614_s15  ;;  %p228_p9 = scmp.ne.s32.totalorder %s1176_s25, %s1172_s24 }
  0x1b   : > { %1582 = sst [smem:[#allocation19_spill]] %s1581_s22  ;;  %p182_p10 = scmp.eq.s32.totalorder %s181_s23, 0 }
  0x1c   : > { %s209_s12 = sor.u32 %s208_s20, %s181_s23  ;;  %p1362_p12 = por %p222_p8, %p1324_p2 }
  0x1d   : > { %p210_p11 = scmp.eq.s32.totalorder %s209_s12, 0  ;;  %p1374_p13 = por %p228_p9, %p1339_p6 }
  0x1e   : > { %s1367_s14 = scalar_select %p182_p10, %s1192_s29, %s184_s16  }
  0x1f   : > { %s1370_s9 = scalar_select %p210_p11, %s1180_s26, %s212_s21  }
  0x20   : > { %1584 = sst [smem:[#allocation20_spill]] %s1367_s14  ;;  %p882_p0 = scmp.ge.s32.totalorder %s1212_s11, 1 }
  0x21   : > { %1585 = sst [smem:[#allocation21_spill]] %s1370_s9  ;;  %p278_p1 = scmp.lt.s32.totalorder %s1212_s11, 9 }
  0x22   : > { %s1586_s27 = scalar_select %p1374_p13, 1, 0 }
  0x23   : > { %p279_p4 = pnand %p882_p0, %p278_p1 }
  0x24   : > { %1587 = sst [smem:[#allocation22_spill]] %s1586_s27  ;;  %s1560_s16 = sand.u32 (!%p279_p4), 1, %s1188_s28  }
  0x25   : > { %282 = sbr.rel (%p279_p4) target bundleno = 1728 (0x6c0), region = 44  ;;  %s1562_s17 = sand.u32 (!%p279_p4), 1, %s1176_s25  }
  0x26   : > { %s1384_s19 = sshll.u32 (!%p279_p4), %s1560_s16, 3  ;;  %s1388_s20 = sshll.u32 (!%p279_p4), %s1562_s17, 3 }
  0x27   : > { %p323_p2 = scmp.lt.s32.totalorder (!%p279_p4), %s1200_s8, 1  ;;  %p327_p5 = scmp.lt.s32.totalorder (!%p279_p4), %s1196_s30, 3 }
  0x28   : > { %s315_s11 = scalar_lea.vmem (!%p279_p4), [#allocation4], %s1384_s19  ;;  %s322_s7 = scalar_lea.vmem (!%p279_p4), [#allocation6], %s1388_s20 }
  0x29   : > { %p889_p6 = scmp.ne.s32.totalorder (!%p279_p4), %s1196_s30, 0 }
  0x2c   : > { %s324_s21 = scalar_select %p323_p2, %s1200_s8, 1 }
  0x2d   : > { %s328_s23 = scalar_select %p327_p5, %s1196_s30, 3 }
  0x2e   : > { %s885_s12 = sshll.u32 %s324_s21, 3  ;;  %339 = sbr.rel (%p889_p6) target bundleno = 363 (0x16b), region = 48  ;;  %vm343_vm0 = vcmask (!%p889_p6), 261120   ;;  %v1214_v2 = vmov (!%p889_p6), 0.0   ;;  %v890_v12 = vld [vmem:[%s1546_s1] ss:$0 sm:$0xff] (!%p889_p6) }
  0x2f   : > { %s1397_s14 = scalar_lea.vmem %s1545_s0, %s885_s12  ;;  %s906_s29 = sshll.u32 %s328_s23, 5  ;;  %373 = vst.msk [vmem:[#allocation3] sm:$0xff] (!%p889_p6), %vm343_vm0, %v1214_v2  ;;  %v891_v14 = vld [vmem:[%s1547_s2] ss:$0 sm:$0xff] (!%p889_p6) }
  0x30   : > { %s1402_s16 = scalar_lea.vmem %s1548_s3, %s906_s29  ;;  %s888_s27 = sshll.u32 %s328_s23, 3  ;;  %v340_v0 = vld [vmem:[%s1397_s14] sm:$0xff] (!%p889_p6) }
  0x31   : > { %s1407_s22 = scalar_lea.vmem %s1549_s4, %s888_s27  ;;  %v344_v1 = vsel (!%p889_p6), %vm343_vm0, %v340_v0, 0.0 }
  0x32   : > { %345 = vadd.xlane.f32.xlu0 (!%p889_p6), %v344_v1 }
  0xbf   : > { %v346_v3 = vpop.xlane.xlu0 %345 }
  0xc0   : > { %v348_v4 = vmul.f32 0.03125, %v346_v3 }
  0xc2   : > { %v349_v5 = vsub.f32 %v340_v0, %v348_v4 }
  0xc4   : > { %v350_v6 = vmul.f32 %v349_v5, %v349_v5 }
  0xc6   : > { %v351_v7 = vsel %vm343_vm0, %v350_v6, 0.0 }
  0xc7   : > { %352 = vadd.xlane.f32.xlu0 %v351_v7 }
 0x154   : > { %v353_v8 = vpop.xlane.xlu0 %352 }
 0x155   : > { %v354_v9 = vmul.f32 0.03125, %v353_v8 }
 0x157   : > { %v355_v10 = vadd.f32 1e-05, %v354_v9 }
 0x159   : > { %1056 = vrsqrt.f32 %v355_v10 }
 0x163   : > { %v1057_v11 = vpop.eup %1056 }
 0x164   : > { %v357_v13 = vmul.f32 %v1057_v11, %v349_v5 }
 0x166   : > { %v364_v15 = vmul.f32 %v890_v12, %v357_v13 }
 0x168   : > { %v371_v16 = vadd.f32 %v891_v14, %v364_v15 }
 0x16a   : > { %372 = vst.msk [vmem:[#allocation2] sm:$0xff] %vm343_vm0, %v371_v16 }
 0x16b PF: > { %v375_v17 = vld [vmem:[%s1402_s16] sm:$0xff]  ;;  %v376_v18 = vld [vmem:[%s1402_s16 + $0x8] sm:$0xff]  ;;  %v377_v19 = vld [vmem:[%s1402_s16 + $0x10] sm:$0xff]  ;;  %v1215_v20 = vmov 0.0|0.0   ;;  %vm1216_vm1 = vmmov 0   ;;  %v1217_v23 = vmov 0.0  }
 0x16c   : > { %944 = vmatprep.subr.bf16.mxu0 %v1215_v20  ;;  %v945_v21 = vpack.c.bf16 %v376_v18, %v375_v17  ;;  %v378_v22 = vld [vmem:[%s1402_s16 + $0x18] sm:$0xff]  ;;  %926 = vmatprep.mubr.msk.f32.mxu0 %vm1216_vm1, %v1217_v23  ;;  %vm379_vm2 = vcmask 261120   ;;  %s1218_s9 = smov 120   ;;  %vm456_vm3 = vcmask 64512   ;;  %s1219_s10 = smov 112   ;;  %v624_v38 = vld [vmem:[%s1407_s22] sm:$0xff] }
 0x16d   : > { %929 = vmatprep.subr.mxu1 %v1217_v23  ;;  %931 = vmatprep.mubr.msk.f32.mxu1 %vm1216_vm1, %v1217_v23  ;;  %v948_v24 = vpack.c.bf16 %v378_v22, %v377_v19  ;;  %v623_v48 = vld [vmem:[#allocation3] sm:$0xff]  ;;  %p897_p8 = scmp.ne.s32.totalorder %s1196_s30, 3 }
 0x16e   : > { %946 = vmatpush3.bf16.msra.mxu0 %v945_v21  ;;  %v704_v52 = vld [vmem:[%s1397_s14] sm:$0xff] (!%p897_p8) }
 0x16f   : > { %947 = vmatprep.subr.bf16.mxu0 %v1215_v20  ;;  %v898_v54 = vld [vmem:[%s1550_s5] ss:$0 sm:$0xff] (!%p897_p8) }
 0x171   : > { %v374_v25 = vld [vmem:[#allocation2] sm:$0xff] }
 0x172   : > { %949 = vmatpush3.bf16.msra.mxu0 %v948_v24 }
 0x173   : > { %939 = vmatprep.subr.mxu0 %v1217_v23 }
 0x175   : > { %927 = vmatmul.mubr.msk.f32.vlgmr.msra.gmra.mrb[0].mxu0 %vm379_vm2, %v374_v25 }
 0x176   : > { %941 = vmatprep.mubr.msk.f32.mxu0 %vm1216_vm1, %v1217_v23  ;;  %940 = vmatpush3.msra.mxu0 %v624_v38 }
 0x248   : > { %v449_v26 = vpop.f32.mrb[0].mxu0 }
 0x249   : > { %454 = vrot.lane.b32.xlu0 %v449_v26, %s1218_s9  ;;  %v928_v27 = vpop.f32.mrb[1].mxu0 }
 0x2bb   : > { %v455_v28 = vpop.permute.xlu0 %454 }
 0x2bc   : > { %930 = vmatpush3.xpose.msk.msra.mxu1 %vm456_vm3, %v455_v28 }
 0x2bd   : > { %934 = vmatprep.subr.mxu1 %v1217_v23 }
 0x2bf   : > { %932 = vmatmul.mubr.msk.f32.vlgmr.msra.gmra.mrb[0].mxu1 %vm456_vm3, %v449_v26 }
 0x2c0   : > { %936 = vmatprep.mubr.msk.f32.mxu1 %vm1216_vm1, %v1217_v23 }
 0x392   : > { %v527_v29 = vpop.f32.mrb[0].mxu1 }
 0x393   : > { %v531_v30 = vmul.f32 0.35355338, %v527_v29  ;;  %v933_v31 = vpop.f32.mrb[1].mxu1 }
 0x395   : > { %v532_v32 = vsel %vm456_vm3, %v531_v30, -inf }
 0x396   : > { %533 = vmax.xlane.f32.xlu0 %v532_v32 }
 0x423   : > { %v534_v33 = vpop.xlane.xlu0 %533 }
 0x424   : > { %v535_v34 = vsub.f32 %v531_v30, %v534_v33 }
 0x426   : > { %v536_v35 = vmul.f32 1.442695, %v535_v34 }
 0x428   : > { %1058 = vpow2.f32 %v536_v35 }
 0x432   : > { %v1059_v36 = vpop.eup %1058 }
 0x433   : > { %v538_v37 = vsel %vm456_vm3, %v1059_v36, 0.0 }
 0x434   : > { %539 = vadd.xlane.f32.xlu1 %v538_v37 }
 0x445   : > { %547 = vrot.lane.b32.xlu1 %v449_v26, %s1219_s10 }
 0x4c1   : > { %v540_v39 = vpop.xlane.xlu1 %539 }
 0x4c2   : > { %1060 = vrcp.f32 %v540_v39 }
 0x4c5   : > { %v548_v40 = vpop.permute.xlu1 %547 }
 0x4c6   : > { %935 = vmatpush3.msra.mxu1 %v548_v40 }
 0x4cc   : > { %v1061_v41 = vpop.eup %1060 }
 0x4cd   : > { %v542_v42 = vmul.f32 %v1061_v41, %v540_v39 }
 0x4cf   : > { %v543_v43 = vsub.f32 2.0, %v542_v42 }
 0x4d1   : > { %v544_v44 = vmul.f32 %v1061_v41, %v543_v43 }
 0x4d3   : > { %v545_v45 = vmul.f32 %v1059_v36, %v544_v44 }
 0x4d5   : > { %546 = vst.msk [vmem:[%s322_s7] sm:$0xff] %vm456_vm3, %v545_v45  ;;  %937 = vmatmul.mubr.msk.f32.vlgmr.msra.gmra.mrb[2].mxu1 %vm456_vm3, %v545_v45 }
 0x5a8   : > { %v619_v46 = vpop.f32.mrb[2].mxu1 }
 0x5a9   : > { %v938_v47 = vpop.f32.mrb[3].mxu1  ;;  %942 = vmatmul.mubr.msk.f32.vlgmr.msra.gmra.mrb[2].mxu0 %vm456_vm3, %v619_v46 }
 0x679   : > { %703 = sbr.rel (%p897_p8) target bundleno = 1676 (0x68c), region = 52 }
 0x67c   : > { %v694_v49 = vpop.f32.mrb[2].mxu0 }
 0x67d   : > { %v698_v50 = vadd.f32 %v694_v49, %v623_v48  ;;  %v943_v51 = vpop.f32.mrb[3].mxu0 }
 0x67f   : > { %699 = vst.msk [vmem:[#allocation3] sm:$0xff] %vm379_vm2, %v698_v50 }
 0x686   : > { %v705_v53 = vld [vmem:[#allocation3] sm:$0xff] }
 0x687   : > { %v706_v55 = vadd.f32 %v705_v53, %v704_v52 }
 0x689   : > { %v714_v56 = vadd.f32 %v898_v54, %v706_v55 }
 0x68b   : > { %715 = vst.msk [vmem:[%s315_s11] sm:$0xff] %vm379_vm2, %v714_v56 }
 0x68c PF: > { %s901_s16 = sshll.u32 %s1200_s8, 7  ;;  %s735_s23 = sshll.u32 %s315_s11, 4  ;;  %s736_s23 = int_to_ptr.vmem [resolvable:$true] %s735_s23 }
 0x68d   : > { %s1455_s14 = scalar_lea.hbm %s1551_s6, %s901_s16  ;;  %s1588_s12 = sand.u32 1, %s1188_s28  }
 0x68e   : > { %s717_s24 = scalar_lea.sflag [#allocation5], %s1588_s12  ;;  %s1062_s26 = scalar_lea.vmem %s736_s23, 128 }
 0x68f   : > { %p1063_p9 = scmp.ne.s32.totalorder %s736_s23, %s1062_s26  ;;  %s1220_s27 = smov [#allocation4]  }
 0x690   : > { %s1066_s29 = sshll.u32 %s1220_s27, 4  ;;  %s1067_s29 = int_to_ptr.vmem [resolvable:$false] %s1066_s29 }
 0x691   : > { %p1064_p10 = pnand %p1063_p9, %p1333_p3  ;;  %s1068_s9 = scalar_lea.vmem %s1067_s29, 256 }
 0x692   : > { %p1069_p0 = scmp.lt.s32.totalorder %s736_s23, %s1067_s29  ;;  %p1070_p1 = scmp.lt.s32.totalorder %s1068_s9, %s1062_s26 }
 0x693   : > { %p1065_p11 = pneg %p1064_p10 }
 0x694   : > { %p1071_p4 = por %p1070_p1, %p1069_p0 }
 0x696   : > { %p1072_p2 = pnand %p1071_p4, %p1065_p11 }
 0x698   : > { %1075 = shalt.err (!%p1072_p2)
}
 0x699   : > { %s1076_s11 = scalar_lea.hbm %s1455_s14, 128  ;;  %s1080_s15 = scalar_lea.hbm %s1551_s6, 256 }
 0x69a   : > { %p1077_p5 = scmp.ne.s32.totalorder %s1455_s14, %s1076_s11  ;;  %p1081_p9 = scmp.lt.u32.totalorder %s1455_s14, %s1551_s6 }
 0x69b   : > { %p1082_p10 = scmp.lt.u32.totalorder %s1080_s15, %s1076_s11  ;;  %p1084_p0 = scmp.lt.u32.totalorder %s1076_s11, %s1455_s14 }
 0x69c   : > { %p1078_p6 = pnand %p1077_p5, %p1333_p3 }
 0x69d   : > { %p1083_p11 = por %p1082_p10, %p1081_p9 }
 0x69e   : > { %p1079_p8 = pneg %p1078_p6 }
 0x69f   : > { %p1085_p1 = por %p1084_p0, %p1083_p11 }
 0x6a1   : > { %p1086_p4 = pnand %p1085_p1, %p1079_p8 }
 0x6a3   : > { %1089 = shalt.err (!%p1086_p4)
}
 0x6a4   : > { %950 = dma.vmem_to_hbm [thread:$0]  (%p1333_p3), %s736_s23, 128, %s1455_s14, %s717_s24  }
 0x6a5   : > { %s902_s17 = sshll.u32 %s1200_s8, 2  ;;  %s750_s21 = sshll.u32 %s322_s7, 4  ;;  %s1482_s21 = int_to_ptr.vmem [resolvable:$true] %s750_s21 }
 0x6a6   : > { %s746_s12 = sadd.s32 %s1196_s30, %s902_s17  ;;  %s1589_s18 = sld [smem:[#allocation23_spill]] }
 0x6a7   : > { %s903_s26 = sshll.u32 %s746_s12, 7  ;;  %s1590_s11 = sand.u32 1, %s1176_s25  }
 0x6a8   : > { %s722_s19 = scalar_lea.sflag [#allocation7], %s1590_s11  ;;  %s1090_s10 = scalar_lea.vmem %s1482_s21, 128 }
 0x6a9   : > { %p1091_p2 = scmp.ne.s32.totalorder %s1482_s21, %s1090_s10  ;;  %s1221_s8 = smov [#allocation6]  }
 0x6aa   : > { %s1094_s7 = sshll.u32 %s1221_s8, 4  ;;  %s1095_s7 = int_to_ptr.vmem [resolvable:$false] %s1094_s7 }
 0x6ab   : > { %p1092_p3 = pnand %p1091_p2, %p1362_p12  ;;  %s1096_s30 = scalar_lea.vmem %s1095_s7, 256 }
 0x6ac   : > { %s748_s9 = scalar_lea.hbm %s1589_s18, %s903_s26  ;;  %p1097_p6 = scmp.lt.s32.totalorder %s1482_s21, %s1095_s7 }
 0x6ad   : > { %p1093_p5 = pneg %p1092_p3  ;;  %p1098_p8 = scmp.lt.s32.totalorder %s1096_s30, %s1090_s10 }
 0x6af   : > { %p1099_p9 = por %p1098_p8, %p1097_p6 }
 0x6b1   : > { %p1100_p10 = pnand %p1099_p9, %p1093_p5 }
 0x6b3   : > { %1103 = shalt.err (!%p1100_p10)
}
 0x6b4   : > { %s1104_s20 = scalar_lea.hbm %s748_s9, 128  ;;  %s1108_s24 = scalar_lea.hbm %s1589_s18, 1024 }
 0x6b5   : > { %p1105_p11 = scmp.ne.s32.totalorder %s748_s9, %s1104_s20  ;;  %p1109_p4 = scmp.lt.u32.totalorder %s748_s9, %s1589_s18 }
 0x6b6   : > { %p1110_p2 = scmp.lt.u32.totalorder %s1108_s24, %s1104_s20  ;;  %p1112_p13 = scmp.lt.u32.totalorder %s1104_s20, %s748_s9 }
 0x6b7   : > { %p1106_p0 = pnand %p1105_p11, %p1362_p12 }
 0x6b8   : > { %p1111_p3 = por %p1110_p2, %p1109_p4 }
 0x6b9   : > { %p1107_p1 = pneg %p1106_p0 }
 0x6ba   : > { %p1113_p6 = por %p1112_p13, %p1111_p3 }
 0x6bc   : > { %p1114_p5 = pnand %p1113_p6, %p1107_p1 }
 0x6be   : > { %1117 = shalt.err (!%p1114_p5)
}
 0x6bf   : > { %951 = dma.vmem_to_hbm [thread:$0]  (%p1362_p12), %s1482_s21, 128, %s748_s9, %s722_s19  }
 0x6c0 PF: > { %s1591_s16 = sld [smem:[#allocation16_spill]]  ;;  %s1592_s17 = sld [smem:[#allocation12_spill]] }
 0x6c6   : > { %p961_p8 = scmp.ge.s32.totalorder %s1591_s16, 2  ;;  %s762_s26 = sand.u32 1, %s1592_s17  }
 0x6c7   : > { %s763_s27 = scalar_lea.sflag [#allocation5], %s762_s26 }
 0x6c8   : > { %p955_p9 = pnand %p961_p8, %p1350_p7 }
 0x6ca   : > { %1163 = dma.done.wait (!%p955_p9), %s763_s27, 128  }
 0x6cb   : > { %1165 = vsyncadd (!%p955_p9), %s763_s27, 4294967168  ;;  %s1594_s29 = sld [smem:[#allocation10_spill]]  ;;  %s1595_s11 = sld [smem:[#allocation22_spill]] }
 0x6d1   : > { %s771_s10 = sand.u32 1, %s1594_s29   ;;  %p1596_p13 = scmp.ne.s32.totalorder %s1595_s11, 0 }
 0x6d2   : > { %s772_s8 = scalar_lea.sflag [#allocation7], %s771_s10 }
 0x6d3   : > { %p958_p10 = pnand %p961_p8, %p1596_p13 }
 0x6d5   : > { %1167 = dma.done.wait (!%p958_p10), %s772_s8, 128  }
 0x6d6   : > { %1169 = vsyncadd (!%p958_p10), %s772_s8, 4294967168  ;;  %s24_s11 = sadd.s32 1, %s1591_s16   ;;  %s1597_s13 = sld [smem:[#allocation11_spill]] }
 0x6d7   : > { %p21_p12 = scmp.ge.s32.totalorder %s24_s11, 10   ;;  %s1598_s26 = sld [smem:[#allocation21_spill]] }
 0x6d8   : > { %s1599_s21 = sld [smem:[#allocation13_spill]]  ;;  %s1600_s29 = sld [smem:[#allocation20_spill]] }
 0x6d9   : > { %s1601_s30 = sld [smem:[#allocation14_spill]]  ;;  %s1602_s8 = sld [smem:[#allocation15_spill]] }
 0x6da   : > { %s1603_s9 = sld [smem:[#allocation17_spill]]  ;;  %s1604_s10 = sld [smem:[#allocation18_spill]] }
 0x6db   : > { %s1605_s24 = smov %s1176_s25  ;;  %s1607_s27 = smov %s1188_s28 }
 0x6dc   : > { %s1606_s25 = smov %s1597_s13  ;;  %23 = sbr.rel (!%p21_p12) target bundleno = 11 (0xb), region = 110 }
 0x6de   : > { %s1608_s28 = smov %s1599_s21 }
 0x6e3   :  { %777 = vsyncpa [#allocation5], 1 }
 0x6e4   :  { %779 = vsyncpa [#allocation5 + $0x1], 1 }
 0x6e5   :  { %780 = vsyncpa [#allocation7], 1 }
 0x6e6   :  { %782 = vsyncpa [#allocation7 + $0x1], 1 }

</bundles_post_ra>
